<compile_context>
chip_gen: v6e
topology: v6e:2x2x1
jax: 0.10.0
libtpu: 0.0.40
codegen_flags: <defaults>
</compile_context>

<pallas_src>
import jax
import jax.numpy as jnp
from jax import lax
from jax.experimental import pallas as pl
from jax.experimental.pallas import tpu as pltpu

_LANE = 128


def _round_up(x, m):
    return ((x + m - 1) // m) * m


def _batch_tiling(B, max_blk=256):
    """Single big sublane-aligned block on single-TC chips (v5e/v6e); only
    split when the batch exceeds max_blk rows."""
    # TODO(synk): on v7x (2 TCs) prefer >=2 blocks + length-sorted rows so each
    # block's trip count is tight; needs reliable core-count detection.
    Bp = _round_up(B, 8)
    if Bp <= max_blk:
        return Bp, Bp
    nblk = (Bp + max_blk - 1) // max_blk
    Bblk = _round_up((Bp + nblk - 1) // nblk, 8)
    return nblk * Bblk, Bblk


def lstm_block_kernel(blkmax_ref, lens_ref, x_ref, wih_ref, whh_ref, b_ref,
                      o_ref, xproj_ref, h_ref, c_ref):
    """Grid = (batch block, time chunk).  Time chunks are serial ("arbitrary");
    (h, c) live in VMEM scratch across chunks of the same batch block.

    x_ref     : (Tc, Bblk, E)   f32   time-major embedded chunk (zero padded)
    wih_ref   : (E, 4*Hp)       bf16  fused-gate input weights   (resident)
    whh_ref   : (Hp, 4*Hp)      bf16  fused-gate recurrent weights (resident)
    b_ref     : (1, 4*Hp)       f32   combined bias b_ih + b_hh  (resident)
    lens_ref  : (Bblk, 1)       int32 per-row valid lengths
    blkmax_ref: (nblk,) SMEM    per-block max length (dynamic trip count)
    o_ref     : (Bblk, Hp)      f32   last hidden state per row
    xproj_ref : (Tc, Bblk, 4*Hp) f32  scratch: hoisted input projection
    h_ref/c_ref: (Bblk, Hp)     f32   scratch: recurrent state carry
    """
    blk = pl.program_id(0)
    tc = pl.program_id(1)
    ntc = pl.num_programs(1)
    Tc, Bblk, E = x_ref.shape
    Hp = whh_ref.shape[0]
    Hp4 = wih_ref.shape[1]

    # Fresh (h, c) state at the first time-chunk of every batch block.
    @pl.when(tc == 0)
    def _():
        h_ref[...] = jnp.zeros_like(h_ref)
        c_ref[...] = jnp.zeros_like(c_ref)

    t0 = tc * Tc
    # Steps actually needed in this chunk for this block (0 once all rows done).
    n_steps = jnp.clip(blkmax_ref[blk] - t0, 0, Tc)

    @pl.when(n_steps > 0)
    def _():
        # Hoisted input projection for the whole chunk: one big bf16 MXU matmul
        # with f32 accumulation.  Only h @ W_hh stays inside the serial chain.
        x_flat = x_ref[...].astype(jnp.bfloat16).reshape(Tc * Bblk, E)
        xp = jnp.dot(x_flat, wih_ref[...], preferred_element_type=jnp.float32)
        xproj_ref[...] = (xp + b_ref[...]).reshape(Tc, Bblk, Hp4)

        lens = lens_ref[...]                         # (Bblk, 1) int32

        def step(t, carry):
            h, c = carry
            gates = xproj_ref[t] + jnp.dot(
                h.astype(jnp.bfloat16), whh_ref[...],
                preferred_element_type=jnp.float32)
            # Gate packing is (i, f, o, g): one contiguous sigmoid slice and
            # one tanh slice; every slice start is 128-lane aligned.
            sig = jax.nn.sigmoid(gates[:, :3 * Hp])
            i_g = sig[:, 0 * Hp:1 * Hp]
            f_g = sig[:, 1 * Hp:2 * Hp]
            o_g = sig[:, 2 * Hp:3 * Hp]
            g_g = jnp.tanh(gates[:, 3 * Hp:])
            c_new = f_g * c + i_g * g_g
            h_new = o_g * jnp.tanh(c_new)
            valid = (t0 + t) < lens                  # per-row prefix mask
            return (jnp.where(valid, h_new, h), jnp.where(valid, c_new, c))

        h, c = lax.fori_loop(0, n_steps, step, (h_ref[...], c_ref[...]))
        h_ref[...] = h
        c_ref[...] = c

    # Lane-dense (Bblk, Hp) store of the final hidden state.
    @pl.when(tc == ntc - 1)
    def _():
        o_ref[...] = h_ref[...]


def net_forward(sent, masksent, params, *, time_chunk=32, max_batch_block=256):
    """Mirrors Net.forward(sent, masksent) -> (B, H) last hidden states."""
    emb_w, w_ih, w_hh, b_ih, b_hh = params
    B, T = sent.shape
    E = emb_w.shape[1]
    H = w_hh.shape[1]

    Hp = _round_up(H, _LANE)
    Bp, Bblk = _batch_tiling(B, max_batch_block)
    nblk = Bp // Bblk
    Tc = min(T, time_chunk)
    T_pad = _round_up(T, Tc)
    ntc = T_pad // Tc

    lengths = jnp.sum(masksent, axis=1).astype(jnp.int32)     # torch.sum(maski)

    # Embedding gather in glue (XLA gather), natural width E (no lane padding).
    # TODO(synk): fuse the gather into the kernel via scalar-prefetched token
    # ids + pl.Element row-gather BlockSpec to save one (B,T,E) HBM round trip.
    x_emb = emb_w[sent].astype(jnp.float32)                   # (B, T, E)
    x_t = jnp.transpose(x_emb, (1, 0, 2))                     # time-major
    x_pad = jnp.zeros((T_pad, Bp, E), jnp.float32).at[:T, :B, :].set(x_t)

    # Fused-gate weights in (i, f, o, g) packing (PyTorch storage is i,f,g,o),
    # bf16 for the MXU, zero-padded to 128-lane gate slots.  Zero padding is
    # what keeps padded hidden lanes at exactly 0 (see invariant note above).
    perm = jnp.array([0, 1, 3, 2])                            # i, f, o, g
    wih_g = jnp.transpose(w_ih.reshape(4, H, E)[perm], (2, 0, 1))   # (E, 4, H)
    whh_g = jnp.transpose(w_hh.reshape(4, H, H)[perm], (2, 0, 1))   # (H, 4, H)
    wih_pad = (jnp.zeros((E, 4, Hp), jnp.bfloat16)
               .at[:, :, :H].set(wih_g.astype(jnp.bfloat16)).reshape(E, 4 * Hp))
    whh_pad = (jnp.zeros((Hp, 4, Hp), jnp.bfloat16)
               .at[:H, :, :H].set(whh_g.astype(jnp.bfloat16)).reshape(Hp, 4 * Hp))
    b_pad = (jnp.zeros((4, Hp), jnp.float32)
             .at[:, :H].set((b_ih + b_hh).reshape(4, H)[perm]).reshape(1, 4 * Hp))

    lens_pad = jnp.zeros((Bp, 1), jnp.int32).at[:B, 0].set(lengths)
    blk_max = jnp.max(lens_pad.reshape(nblk, Bblk), axis=1).astype(jnp.int32)

    # VMEM budget for the chosen tile (+50% headroom, capped for v7x's 64 MiB).
    vmem_est = (2 * Tc * Bblk * E * 4            # x chunk (double-buffered)
                + Tc * Bblk * 4 * Hp * 4         # xproj scratch (f32)
                + E * 4 * Hp * 2                 # W_ih bf16 (single-buffered)
                + Hp * 4 * Hp * 2                # W_hh bf16 (single-buffered)
                + 4 * Hp * 4                     # bias
                + 4 * Bblk * Hp * 4              # h, c + out double-buffer
                + 4 * Bblk * 4)                  # lens
    vmem_limit = min(64 * 1024 * 1024, max(int(vmem_est * 1.5), 32 * 1024 * 1024))

    cost = pl.CostEstimate(
        flops=2 * Bp * T_pad * E * 4 * Hp + 2 * Bp * T_pad * Hp * 4 * Hp,
        transcendentals=5 * Bp * T_pad * Hp,
        bytes_accessed=(T_pad * Bp * E * 4 + E * 4 * Hp * 2 + Hp * 4 * Hp * 2
                        + 4 * Hp * 4 + Bp * Hp * 4 + Bp * 4 + nblk * 4))

    grid_spec = pltpu.PrefetchScalarGridSpec(
        num_scalar_prefetch=1,                                 # blk_max -> SMEM
        grid=(nblk, ntc),
        in_specs=[
            pl.BlockSpec((Bblk, 1), lambda b, t, bm: (b, 0)),            # lengths
            pl.BlockSpec((Tc, Bblk, E), lambda b, t, bm: (t, b, 0)),     # x chunk
            pl.BlockSpec((E, 4 * Hp), lambda b, t, bm: (0, 0),           # W_ih
                         pipeline_mode=pl.Buffered(1)),
            pl.BlockSpec((Hp, 4 * Hp), lambda b, t, bm: (0, 0),          # W_hh
                         pipeline_mode=pl.Buffered(1)),
            pl.BlockSpec((1, 4 * Hp), lambda b, t, bm: (0, 0),           # bias
                         pipeline_mode=pl.Buffered(1)),
        ],
        out_specs=pl.BlockSpec((Bblk, Hp), lambda b, t, bm: (b, 0)),
        scratch_shapes=[
            pltpu.VMEM((Tc, Bblk, 4 * Hp), jnp.float32),   # hoisted projection
            pltpu.VMEM((Bblk, Hp), jnp.float32),           # h carry
            pltpu.VMEM((Bblk, Hp), jnp.float32),           # c carry
        ],
    )

    out = pl.pallas_call(
        lstm_block_kernel,
        out_shape=jax.ShapeDtypeStruct((Bp, Hp), jnp.float32),
        grid_spec=grid_spec,
        compiler_params=pltpu.CompilerParams(
            dimension_semantics=("parallel", "arbitrary"),
            vmem_limit_bytes=vmem_limit),
        cost_estimate=cost,
    )(blk_max, lens_pad, x_pad, wih_pad, whh_pad, b_pad)

    # Dropout(0.5) is identity in eval/inference mode.
    # TODO(synk): training-mode dropout (Bernoulli mask + 1/(1-p) scale) not implemented.
    # Keep this slice: padded rows / padded hidden lanes are only garbage-free
    # because they are removed here.
    return out[:B, :H]


def lstm_ref(x_emb, lengths, w_ih, w_hh, b_ih, b_hh):
    """Pure-JAX f32 reference matching torch.nn.LSTM semantics (gate order i,f,g,o)."""
    T = x_emb.shape[1]
    H = w_hh.shape[1]

    def per_example(x, L):
        def step(carry, inp):
            h, c = carry
            xt, t = inp
            gates = w_ih @ xt + b_ih + w_hh @ h + b_hh
            i, f, g, o = jnp.split(gates, 4)
            c_new = jax.nn.sigmoid(f) * c + jax.nn.sigmoid(i) * jnp.tanh(g)
            h_new = jax.nn.sigmoid(o) * jnp.tanh(c_new)
            valid = t < L
            return (jnp.where(valid, h_new, h), jnp.where(valid, c_new, c)), None

        (h, _), _ = lax.scan(step, (jnp.zeros(H), jnp.zeros(H)),
                             (x, jnp.arange(T)))
        return h

    return jax.vmap(per_example)(x_emb, lengths)


if __name__ == "__main__":
    key = jax.random.PRNGKey(0)
    V = 32                      # |Dictionary|
    E = 50                      # word_embedding_length (module default)
    H = 50                      # LSTM hidden = word_embedding_length
    B, T = 4, 8                 # batch of utterances, max seq length

    k1, k2, k3, k4, k5, k6 = jax.random.split(key, 6)
    emb_w = jax.random.normal(k1, (V, E), jnp.float32) * 0.1     # "GloVe" table
    w_ih = jax.random.normal(k2, (4 * H, E), jnp.float32) * 0.1  # weight_ih_l0
    w_hh = jax.random.normal(k3, (4 * H, H), jnp.float32) * 0.1  # weight_hh_l0
    b_ih = jax.random.normal(k4, (4 * H,), jnp.float32) * 0.1    # bias_ih_l0
    b_hh = jax.random.normal(k5, (4 * H,), jnp.float32) * 0.1    # bias_hh_l0

    sent = jax.random.randint(k6, (B, T), 0, V, dtype=jnp.int32)
    lengths = jnp.array([5, 8, 3, 1], dtype=jnp.int32)           # per-utterance lengths
    masksent = (jnp.arange(T)[None, :] < lengths[:, None]).astype(jnp.int32)

    params = (emb_w, w_ih, w_hh, b_ih, b_hh)
    # time_chunk=4 -> two time-chunks, exercising the chunked-recurrence carry.
    out = net_forward(sent, masksent, params, time_chunk=4)
    out = jax.block_until_ready(out)

    ref = lstm_ref(emb_w[sent], lengths, w_ih, w_hh, b_ih, b_hh)
    assert out.shape == (B, H), out.shape
    # bf16 MXU inputs (f32 accumulation) -> slightly looser tolerance than f32.
    assert jnp.allclose(out, ref, atol=2e-2, rtol=2e-2), \
        float(jnp.max(jnp.abs(out - ref)))
    print("KERNEL_OK")
</pallas_src>

<mosaic_0001>
module attributes {stable_mosaic.version = 11 : i64} {
  func.func @lstm_block_kernel(%arg0: i32, %arg1: i32, %arg2: memref<1xi32, #tpu.memory_space<smem>>, %arg3: memref<8x1xi32, #tpu.memory_space<vmem>>, %arg4: memref<4x8x50xf32, #tpu.memory_space<vmem>>, %arg5: memref<50x512xbf16, #tpu.memory_space<vmem>>, %arg6: memref<128x512xbf16, #tpu.memory_space<vmem>>, %arg7: memref<1x512xf32, #tpu.memory_space<vmem>>, %arg8: memref<8x128xf32, #tpu.memory_space<vmem>>, %arg9: memref<4x8x512xf32, #tpu.memory_space<vmem>>, %arg10: memref<8x128xf32, #tpu.memory_space<vmem>>, %arg11: memref<8x128xf32, #tpu.memory_space<vmem>>) attributes {dimension_semantics = [#tpu.dimension_semantics<parallel>, #tpu.dimension_semantics<arbitrary>], iteration_bounds = array<i64: 1, 2>, scalar_prefetch = 1 : i64, scratch_operands = 3 : i64, tpu.core_type = #tpu.core_type<tc>, window_params = [{transform_indices = @transform_0, window_bounds = array<i64: 8, 1>}, {transform_indices = @transform_1, window_bounds = array<i64: 4, 8, 50>}, {pipeline_mode = #tpu.pipeline_mode<synchronous>, transform_indices = @transform_2, window_bounds = array<i64: 50, 512>}, {pipeline_mode = #tpu.pipeline_mode<synchronous>, transform_indices = @transform_3, window_bounds = array<i64: 128, 512>}, {pipeline_mode = #tpu.pipeline_mode<synchronous>, transform_indices = @transform_4, window_bounds = array<i64: 1, 512>}, {transform_indices = @transform_5, window_bounds = array<i64: 8, 128>}]} {
    %c0_i32 = arith.constant 0 : i32
    %0 = arith.cmpi eq, %arg1, %c0_i32 : i32
    %1 = arith.extui %0 : i1 to i32
    %c0_i32_0 = arith.constant 0 : i32
    %2 = arith.cmpi ne, %1, %c0_i32_0 : i32
    scf.if %2 {
      %cst = arith.constant 0.000000e+00 : f32
      %15 = vector.broadcast %cst : f32 to vector<8x128xf32>
      %c0 = arith.constant 0 : index
      %c0_6 = arith.constant 0 : index
      %16 = vector.load %arg10[%c0, %c0_6] : memref<8x128xf32, #tpu.memory_space<vmem>>, vector<8x128xf32>
      tpu.vector_store %arg10[%c0, %c0_6], %15 {strides = array<i32>} : memref<8x128xf32, #tpu.memory_space<vmem>>, vector<8x128xf32>,
      %cst_7 = arith.constant 0.000000e+00 : f32
      %17 = vector.broadcast %cst_7 : f32 to vector<8x128xf32>
      %c0_8 = arith.constant 0 : index
      %c0_9 = arith.constant 0 : index
      %18 = vector.load %arg11[%c0_8, %c0_9] : memref<8x128xf32, #tpu.memory_space<vmem>>, vector<8x128xf32>
      tpu.vector_store %arg11[%c0_8, %c0_9], %17 {strides = array<i32>} : memref<8x128xf32, #tpu.memory_space<vmem>>, vector<8x128xf32>,
    } else {
    }
    %c4_i32 = arith.constant 4 : i32
    %3 = arith.muli %arg1, %c4_i32 : i32
    %4 = arith.index_cast %arg0 : i32 to index
    %5 = memref.load %arg2[%4] : memref<1xi32, #tpu.memory_space<smem>>
    %6 = arith.subi %5, %3 : i32
    %c0_i32_1 = arith.constant 0 : i32
    %c4_i32_2 = arith.constant 4 : i32
    %7 = arith.maxsi %c0_i32_1, %6 : i32
    %8 = arith.minsi %c4_i32_2, %7 : i32
    %c0_i32_3 = arith.constant 0 : i32
    %9 = arith.cmpi sgt, %8, %c0_i32_3 : i32
    %10 = arith.extui %9 : i1 to i32
    %c0_i32_4 = arith.constant 0 : i32
    %11 = arith.cmpi ne, %10, %c0_i32_4 : i32
    scf.if %11 {
      %c0 = arith.constant 0 : index
      %c0_6 = arith.constant 0 : index
      %c0_7 = arith.constant 0 : index
      %15 = vector.load %arg4[%c0, %c0_6, %c0_7] : memref<4x8x50xf32, #tpu.memory_space<vmem>>, vector<4x8x50xf32>
      %16 = arith.truncf %15 : vector<4x8x50xf32> to vector<4x8x50xbf16>
      %17 = vector.shape_cast %16 : vector<4x8x50xbf16> to vector<32x50xbf16>
      %c0_8 = arith.constant 0 : index
      %c0_9 = arith.constant 0 : index
      %18 = vector.load %arg5[%c0_8, %c0_9] : memref<50x512xbf16, #tpu.memory_space<vmem>>, vector<50x512xbf16>
      %cst = arith.constant dense<0.000000e+00> : vector<32x512xf32>
      %19 = tpu.matmul %17, %18, %cst {dimension_numbers = #tpu.dot_dimension_numbers<[1], [0], [0], [1], [0, 0, 1, 1], [], []>} : vector<32x50xbf16>, vector<50x512xbf16>, vector<32x512xf32> -> vector<32x512xf32>
      %c0_10 = arith.constant 0 : index
      %c0_11 = arith.constant 0 : index
      %20 = vector.load %arg7[%c0_10, %c0_11] : memref<1x512xf32, #tpu.memory_space<vmem>>, vector<1x512xf32>
      %21 = vector.broadcast %20 : vector<1x512xf32> to vector<32x512xf32>
      %22 = arith.addf %19, %21 : vector<32x512xf32>
      %23 = vector.shape_cast %22 : vector<32x512xf32> to vector<4x8x512xf32>
      %c0_12 = arith.constant 0 : index
      %c0_13 = arith.constant 0 : index
      %c0_14 = arith.constant 0 : index
      %24 = vector.load %arg9[%c0_12, %c0_13, %c0_14] : memref<4x8x512xf32, #tpu.memory_space<vmem>>, vector<4x8x512xf32>
      tpu.vector_store %arg9[%c0_12, %c0_13, %c0_14], %23 {strides = array<i32>} : memref<4x8x512xf32, #tpu.memory_space<vmem>>, vector<4x8x512xf32>,
      %c0_15 = arith.constant 0 : index
      %c0_16 = arith.constant 0 : index
      %25 = vector.load %arg3[%c0_15, %c0_16] : memref<8x1xi32, #tpu.memory_space<vmem>>, vector<8x1xi32>
      %c0_17 = arith.constant 0 : index
      %c0_18 = arith.constant 0 : index
      %26 = vector.load %arg10[%c0_17, %c0_18] : memref<8x128xf32, #tpu.memory_space<vmem>>, vector<8x128xf32>
      %c0_19 = arith.constant 0 : index
      %c0_20 = arith.constant 0 : index
      %27 = vector.load %arg11[%c0_19, %c0_20] : memref<8x128xf32, #tpu.memory_space<vmem>>, vector<8x128xf32>
      %c0_i32_21 = arith.constant 0 : i32
      %28 = arith.subi %8, %c0_i32_21 : i32
      %29 = arith.addi %c0_i32_21, %28 : i32
      %c1_i32_22 = arith.constant 1 : i32
      %30:2 = scf.for %arg12 = %c0_i32_21 to %29 step %c1_i32_22 iter_args(%arg13 = %26, %arg14 = %27) -> (vector<8x128xf32>, vector<8x128xf32>)  : i32 {
        %33 = arith.index_cast %arg12 : i32 to index
        %c0_27 = arith.constant 0 : index
        %c0_28 = arith.constant 0 : index
        %34 = vector.load %arg9[%33, %c0_27, %c0_28] : memref<4x8x512xf32, #tpu.memory_space<vmem>>, vector<1x8x512xf32>
        %35 = vector.shape_cast %34 : vector<1x8x512xf32> to vector<8x512xf32>
        %36 = arith.truncf %arg13 : vector<8x128xf32> to vector<8x128xbf16>
        %c0_29 = arith.constant 0 : index
        %c0_30 = arith.constant 0 : index
        %37 = vector.load %arg6[%c0_29, %c0_30] : memref<128x512xbf16, #tpu.memory_space<vmem>>, vector<128x512xbf16>
        %cst_31 = arith.constant dense<0.000000e+00> : vector<8x512xf32>
        %38 = tpu.matmul %36, %37, %cst_31 {dimension_numbers = #tpu.dot_dimension_numbers<[1], [0], [0], [1], [0, 0, 1, 1], [], []>} : vector<8x128xbf16>, vector<128x512xbf16>, vector<8x512xf32> -> vector<8x512xf32>
        %39 = arith.addf %35, %38 : vector<8x512xf32>
        %40 = vector.extract_strided_slice %39 {offsets = [0, 0], sizes = [8, 384], strides = [1, 1]} : vector<8x512xf32> to vector<8x384xf32>
        %41 = arith.negf %40 : vector<8x384xf32>
        %42 = math.exp %41 : vector<8x384xf32>
        %cst_32 = arith.constant 1.000000e+00 : f32
        %43 = vector.broadcast %cst_32 : f32 to vector<8x384xf32>
        %44 = arith.addf %43, %42 : vector<8x384xf32>
        %45 = arith.divf %43, %44 : vector<8x384xf32>
        %46 = vector.extract_strided_slice %45 {offsets = [0, 0], sizes = [8, 128], strides = [1, 1]} : vector<8x384xf32> to vector<8x128xf32>
        %47 = vector.extract_strided_slice %45 {offsets = [0, 128], sizes = [8, 128], strides = [1, 1]} : vector<8x384xf32> to vector<8x128xf32>
        %48 = vector.extract_strided_slice %45 {offsets = [0, 256], sizes = [8, 128], strides = [1, 1]} : vector<8x384xf32> to vector<8x128xf32>
        %49 = vector.extract_strided_slice %39 {offsets = [0, 384], sizes = [8, 128], strides = [1, 1]} : vector<8x512xf32> to vector<8x128xf32>
        %50 = math.tanh %49 : vector<8x128xf32>
        %51 = arith.mulf %47, %arg14 : vector<8x128xf32>
        %52 = arith.mulf %46, %50 : vector<8x128xf32>
        %53 = arith.addf %51, %52 : vector<8x128xf32>
        %54 = math.tanh %53 : vector<8x128xf32>
        %55 = arith.mulf %48, %54 : vector<8x128xf32>
        %56 = arith.addi %3, %arg12 : i32
        %57 = vector.broadcast %56 : i32 to vector<8x1xi32>
        %58 = arith.cmpi slt, %57, %25 : vector<8x1xi32>
        %59 = vector.shape_cast %58 : vector<8x1xi1> to vector<8x1xi1>
        %60 = vector.broadcast %59 : vector<8x1xi1> to vector<8x128xi1>
        %61 = arith.select %60, %55, %arg13 : vector<8x128xi1>, vector<8x128xf32>
        %62 = vector.shape_cast %58 : vector<8x1xi1> to vector<8x1xi1>
        %63 = vector.broadcast %62 : vector<8x1xi1> to vector<8x128xi1>
        %64 = arith.select %63, %53, %arg14 : vector<8x128xi1>, vector<8x128xf32>
        scf.yield %61, %64 : vector<8x128xf32>, vector<8x128xf32>
      }
      %c0_23 = arith.constant 0 : index
      %c0_24 = arith.constant 0 : index
      %31 = vector.load %arg10[%c0_23, %c0_24] : memref<8x128xf32, #tpu.memory_space<vmem>>, vector<8x128xf32>
      tpu.vector_store %arg10[%c0_23, %c0_24], %30#0 {strides = array<i32>} : memref<8x128xf32, #tpu.memory_space<vmem>>, vector<8x128xf32>,
      %c0_25 = arith.constant 0 : index
      %c0_26 = arith.constant 0 : index
      %32 = vector.load %arg11[%c0_25, %c0_26] : memref<8x128xf32, #tpu.memory_space<vmem>>, vector<8x128xf32>
      tpu.vector_store %arg11[%c0_25, %c0_26], %30#1 {strides = array<i32>} : memref<8x128xf32, #tpu.memory_space<vmem>>, vector<8x128xf32>,
    } else {
    }
    %c1_i32 = arith.constant 1 : i32
    %12 = arith.cmpi eq, %arg1, %c1_i32 : i32
    %13 = arith.extui %12 : i1 to i32
    %c0_i32_5 = arith.constant 0 : i32
    %14 = arith.cmpi ne, %13, %c0_i32_5 : i32
    scf.if %14 {
      %c0 = arith.constant 0 : index
      %c0_6 = arith.constant 0 : index
      %15 = vector.load %arg10[%c0, %c0_6] : memref<8x128xf32, #tpu.memory_space<vmem>>, vector<8x128xf32>
      %c0_7 = arith.constant 0 : index
      %c0_8 = arith.constant 0 : index
      %16 = vector.load %arg8[%c0_7, %c0_8] : memref<8x128xf32, #tpu.memory_space<vmem>>, vector<8x128xf32>
      tpu.vector_store %arg8[%c0_7, %c0_8], %15 {strides = array<i32>} : memref<8x128xf32, #tpu.memory_space<vmem>>, vector<8x128xf32>,
    } else {
    }
    return
  }
  func.func @transform_0(%arg0: i32, %arg1: i32, %arg2: memref<1xi32, #tpu.memory_space<smem>>) -> (i32, i32) {
    %c0_i32 = arith.constant 0 : i32
    %c0_i32_0 = arith.constant 0 : i32
    return %arg0, %c0_i32 : i32, i32
  }
  func.func @transform_1(%arg0: i32, %arg1: i32, %arg2: memref<1xi32, #tpu.memory_space<smem>>) -> (i32, i32, i32) {
    %c0_i32 = arith.constant 0 : i32
    %c0_i32_0 = arith.constant 0 : i32
    return %arg1, %arg0, %c0_i32 : i32, i32, i32
  }
  func.func @transform_2(%arg0: i32, %arg1: i32, %arg2: memref<1xi32, #tpu.memory_space<smem>>) -> (i32, i32) {
    %c0_i32 = arith.constant 0 : i32
    %c0_i32_0 = arith.constant 0 : i32
    %c0_i32_1 = arith.constant 0 : i32
    return %c0_i32, %c0_i32_0 : i32, i32
  }
  func.func @transform_3(%arg0: i32, %arg1: i32, %arg2: memref<1xi32, #tpu.memory_space<smem>>) -> (i32, i32) {
    %c0_i32 = arith.constant 0 : i32
    %c0_i32_0 = arith.constant 0 : i32
    %c0_i32_1 = arith.constant 0 : i32
    return %c0_i32, %c0_i32_0 : i32, i32
  }
  func.func @transform_4(%arg0: i32, %arg1: i32, %arg2: memref<1xi32, #tpu.memory_space<smem>>) -> (i32, i32) {
    %c0_i32 = arith.constant 0 : i32
    %c0_i32_0 = arith.constant 0 : i32
    %c0_i32_1 = arith.constant 0 : i32
    return %c0_i32, %c0_i32_0 : i32, i32
  }
  func.func @transform_5(%arg0: i32, %arg1: i32, %arg2: memref<1xi32, #tpu.memory_space<smem>>) -> (i32, i32) {
    %c0_i32 = arith.constant 0 : i32
    %c0_i32_0 = arith.constant 0 : i32
    return %arg0, %c0_i32 : i32, i32
  }
}

</mosaic_0001>

<bundles_post_ra>
// kernel: tpu_custom_call.1
= control target key start
LH: loop header
LB: loop body
LE: loop exit
PB: predicated region body
PF: predicated region fallthrough
CT: control target
= control target key end

     0   :  { %s1827_s0 = inlined_call_operand.<no memory space> [shape: s32[1], index: 0, kind: input, shape index: {}]   ;;  %s1828_s1 = inlined_call_operand.vmem [shape: s32[8,1], index: 1, kind: input, shape index: {}]   ;;  %s1829_s2 = inlined_call_operand.hbm [shape: f32[8,8,50], index: 2, kind: input, shape index: {}]   ;;  %s1830_s3 = inlined_call_operand.hbm [shape: bf16[50,512], index: 3, kind: input, shape index: {}]   ;;  %s1831_s4 = inlined_call_operand.hbm [shape: bf16[128,512], index: 4, kind: input, shape index: {}]   ;;  %s1832_s5 = inlined_call_operand.vmem [shape: f32[1,512], index: 5, kind: input, shape index: {}]   ;;  %s1833_s6 = inlined_call_operand.hbm [shape: f32[8,128], index: 6, kind: output, shape index: {}]  }
   0x1   :  { %11 = sst [smem:[#allocation6]] %s1827_s0 }
   0x2   :  { %12 = vsyncpa [#allocation8], 0 }
   0x3   :  { %14 = vsyncpa [#allocation8 + $0x1], 0 }
   0x4   :  { %15 = vsyncpa [#allocation11], 0 }
   0x5   :  { %16 = vsyncpa [#allocation9], 0  ;;  %s1606_s23 = smov 0   ;;  %s1608_s24 = smov 0  }
   0x6   :  { %s1610_s25 = smov 0   ;;  %s1612_s26 = smov 0  }
   0x7   :  { %s1614_s27 = smov 0   ;;  %s1616_s28 = smov 0  }
   0x8 LB: > { %s1042_s0 = sadd.s32 4294967295, %s1535_s28   ;;  %p82_p0 = scmp.ne.s32.totalorder %s1519_s24, %s1515_s23  ;;  %s1535_s28 = sphi %s1616_s28, %s22_s28   ;;  %s1531_s27 = sphi %s1614_s27, %s1853_s27   ;;  %s1527_s26 = sphi %s1612_s26, %s1852_s26   ;;  %s1523_s25 = sphi %s1610_s25, %s1851_s25   ;;  %s1519_s24 = sphi %s1608_s24, %s1850_s24   ;;  %s1515_s23 = sphi %s1606_s23, %s1849_s23  }
   0x9   : > { %p1638_p1 = scmp.eq.s32.totalorder %s1042_s0, 0  ;;  %p1043_p2 = scmp.ge.s32.totalorder %s1535_s28, 1 }
   0xa   : > { %p182_p3 = scmp.lt.s32.totalorder %s1535_s28, 3  ;;  %s1557_s8 = smov [#allocation10]  }
   0xb   : > { %s1836_s29 = scalar_select %p1638_p1, 1, 0 }
   0xc   : > { %p1646_p4 = por %p1638_p1, %p82_p0  ;;  %p1650_p5 = pnand %p1043_p2, %p182_p3 }
   0xd   : > { %s201_s9 = sshll.u32 %s1557_s8, 4  ;;  %s1558_s11 = smov [#allocation12]   ;;  %s202_s9 = int_to_ptr.vmem [resolvable:$true] %s201_s9 }
   0xe   : > { %p1150_p6 = pneg %p1650_p5  ;;  %s214_s12 = sshll.u32 %s1558_s11, 4  ;;  %s215_s12 = int_to_ptr.vmem [resolvable:$true] %s214_s12 }
   0xf   : > { %s1364_s13 = scalar_lea.vmem %s202_s9, 1792  ;;  %p1372_p12 = scmp.lt.s32.totalorder %s202_s9, %s202_s9 }
  0x10   : > { %p1658_p7 = pnand %p1150_p6, %p1638_p1  ;;  %p1365_p9 = scmp.ne.s32.totalorder %s202_s9, %s1364_s13 }
  0x11   : > { %p1373_p13 = scmp.lt.s32.totalorder %s1364_s13, %s1364_s13 }
  0x12   : > { %p1355_p8 = pneg %p1658_p7 }
  0x13   : > { %p1374_p0 = por %p1373_p13, %p1372_p12 }
  0x14   : > { %p1367_p10 = pnand %p1365_p9, %p1355_p8 }
  0x16   : > { %p1368_p11 = pneg %p1367_p10 }
  0x18   : > { %p1375_p2 = pnand %p1374_p0, %p1368_p11 }
  0x1a   : > { %1378 = shalt.err (!%p1375_p2)
}
  0x1b   : > { %s1559_s14 = smov 256   ;;  %s1560_s15 = smov 16  }
  0x1c   : > { %1153 = dma.hbm_to_vmem [thread:$0]  (!%p1658_p7), %s1830_s3, 1792, %s202_s9, [#allocation11], %s1559_s14, %s1559_s14, %s1560_s15  }
  0x1d   : > { %s1390_s18 = scalar_lea.vmem %s215_s12, 4096  ;;  %p1398_p10 = scmp.lt.s32.totalorder %s215_s12, %s215_s12 }
  0x1e   : > { %p1391_p3 = scmp.ne.s32.totalorder %s215_s12, %s1390_s18  ;;  %p1399_p1 = scmp.lt.s32.totalorder %s1390_s18, %s1390_s18 }
  0x20   : > { %p1393_p6 = pnand %p1391_p3, %p1355_p8  ;;  %p1400_p12 = por %p1399_p1, %p1398_p10 }
  0x22   : > { %p1394_p9 = pneg %p1393_p6 }
  0x24   : > { %p1401_p11 = pnand %p1400_p12, %p1394_p9 }
  0x26   : > { %1404 = shalt.err (!%p1401_p11)
}
  0x27   : > { %1156 = dma.hbm_to_vmem [thread:$0]  (!%p1658_p7), %s1831_s4, 4096, %s215_s12, [#allocation11], %s1559_s14, %s1559_s14, %s1560_s15  }
  0x28   : > { %s31_s21 = sadd.s32 1, %s1531_s27  ;;  %s69_s22 = sadd.s32 1, %s1523_s25 }
  0x29   : > { %p32_p1 = scmp.ge.s32.totalorder %s31_s21, 2  ;;  %p76_p8 = scmp.ne.s32.totalorder %s1523_s25, %s1519_s24 }
  0x2a   : > { %p77_p13 = scmp.eq.s32.totalorder %s1535_s28, 0  ;;  %p1163_p0 = scmp.lt.s32.totalorder %s1535_s28, 2 }
  0x2b   : > { %s1855_s21 = smov (%p32_p1, %s31_s21), 0  ;;  %s231_s23 = sand.u32 1, %s1523_s25  }
  0x2c   : > { %p78_p2 = por %p77_p13, %p76_p8  ;;  %s64_s8 = ssub.s32 %s1531_s27, %s1855_s21 }
  0x2d   : > { %p67_p3 = scmp.eq.s32.totalorder %s64_s8, 0  ;;  %s1048_s9 = sshll.u32 %s231_s23, 5 }
  0x2e   : > { %s1130_s10 = sshll.u32 %s1531_s27, 9  ;;  %s235_s15 = scalar_lea.vmem [#allocation7], %s1048_s9 }
  0x2f   : > { %s1693_s11 = scalar_select %p67_p3, %s1523_s25, %s69_s22  }
  0x30   : > { %s242_s14 = scalar_lea.hbm %s1829_s2, %s1130_s10  ;;  %s243_s16 = sshll.u32 %s235_s15, 4  ;;  %s244_s16 = int_to_ptr.vmem [resolvable:$true] %s243_s16 }
  0x31   : > { %p1700_p7 = pnand %p1163_p0, %p78_p2  ;;  %s232_s18 = scalar_lea.sflag [#allocation8], %s231_s23 }
  0x32   : > { %s1418_s19 = scalar_lea.vmem %s244_s16, 512  ;;  %s1561_s20 = smov [#allocation7]  }
  0x33   : > { %p1407_p6 = pneg %p1700_p7  ;;  %p1419_p9 = scmp.ne.s32.totalorder %s244_s16, %s1418_s19 }
  0x34   : > { %s1423_s22 = sshll.u32 %s1561_s20, 4  ;;  %s1424_s22 = int_to_ptr.vmem [resolvable:$false] %s1423_s22 }
  0x35   : > { %p1421_p10 = pnand %p1419_p9, %p1407_p6  ;;  %s1425_s8 = scalar_lea.vmem %s1424_s22, 1024 }
  0x36   : > { %p1426_p11 = scmp.lt.s32.totalorder %s244_s16, %s1424_s22  ;;  %p1427_p1 = scmp.lt.s32.totalorder %s1425_s8, %s1418_s19 }
  0x37   : > { %p1422_p12 = pneg %p1421_p10 }
  0x38   : > { %p1428_p8 = por %p1427_p1, %p1426_p11 }
  0x3a   : > { %p1429_p13 = pnand %p1428_p8, %p1422_p12 }
  0x3c   : > { %1432 = shalt.err (!%p1429_p13)
}
  0x3d   : > { %s1562_s9 = smov 128   ;;  %s1563_s10 = smov 8  }
  0x3e   : > { %1160 = dma.hbm_to_vmem [thread:$0]  (!%p1700_p7), %s242_s14, 512, %s244_s16, %s232_s18, %s1562_s9, %s1562_s9, %s1563_s10  }
  0x3f   : > { %255 = sbr.rel (%p1650_p5) target bundleno = 638 (0x27e), region = 40  ;;  %s257_s23 = sand.u32 (!%p1650_p5), 1, %s1519_s24  }
  0x40   : > { %s1052_s13 = sshll.u32 (!%p1650_p5), %s257_s23, 5  ;;  %s258_s12 = scalar_lea.sflag (!%p1650_p5), [#allocation8], %s257_s23 }
  0x41   : > { %s1711_s15 = scalar_lea.vmem (!%p1650_p5), [#allocation7], %s1052_s13 }
  0x44   : > { %1502 = dma.done.wait (%p1646_p4), %s258_s12, 512  }
  0x45   : > { %1504 = vsyncadd (%p1646_p4), %s258_s12, 4294966784  ;;  %p1841_p0 = scmp.ne.s32.totalorder %s1836_s29, 0 }
  0x47   : > { %1506 = dma.done.wait (%p1841_p0), [#allocation11], 5888  }
  0x48   : > { %1508 = vsyncadd (%p1841_p0), [#allocation11], 4294961408  ;;  %p1055_p5 = scmp.ne.s32.totalorder %s1527_s26, 0 }
  0x4a   : > { %304 = sbr.rel (%p1055_p5) target bundleno = 81 (0x51), region = 56 }
  0x4f   : > { %v1564_v0 = vmov 0.0  }
  0x50   : > { %305 = vst [vmem:[#allocation3] sm:$0xff] %v1564_v0  ;;  %306 = vst [vmem:[#allocation4] sm:$0xff] %v1564_v0 }
  0x51 PF: > { %s308_s7 = sld [smem:[#allocation6]]  ;;  %s1056_s14 = sshll.u32 %s1527_s26, 2 }
  0x57   : > { %s309_s30 = ssub.s32 %s308_s7, %s1056_s14 }
  0x58   : > { %p310_p4 = scmp.gt.s32.totalorder %s309_s30, 0  ;;  %p1057_p2 = scmp.lt.s32.totalorder %s309_s30, 4 }
  0x5a   : > { %s1857_s30 = smov (!%p310_p4, %s309_s30), 0 }
  0x5b   : > { %s1859_s30 = smov (!%p1057_p2, %s1857_s30), 4 }
  0x5c   : > { %p1062_p3 = scmp.le.s32.totalorder %s1859_s30, 0 }
  0x5e   : > { %317 = sbr.rel (%p1062_p3) target bundleno = 614 (0x266), region = 60 }
  0x63   : > { %v338_v1 = vld [vmem:[#allocation10 + $0x60] sm:$0x11]  ;;  %vm449_vm0 = vcmask 1040384   ;;  %v339_v2 = vld [vmem:[#allocation10 + $0x68] sm:$0x11]  ;;  %v1565_v15 = vmov 0   ;;  %v342_v31 = vlaneseq }
  0x64   : > { %v1078_v3 = vcombine.high %v338_v1, %v338_v1  ;;  %v1080_v4 = vcombine.high %v339_v2, %v339_v2  ;;  %v1077_v5 = vcombine.low %v338_v1, %v338_v1  ;;  %v1079_v6 = vcombine.low %v339_v2, %v339_v2  ;;  %v1270_v7 = vld [vmem:[#allocation10 + $0x44] ss:$16 sps:$4 sm:$0xff]   ;;  %v1272_v8 = vld [vmem:[#allocation10 + $0x4c] ss:$16 sps:$4 sm:$0xff]   ;;  %v1274_v9 = vld [vmem:[#allocation10 + $0x40] ss:$16 sps:$4 sm:$0xff]   ;;  %494 = vmatprep.mubr.bf16.mxu0 %v1565_v15 }
  0x65   : > { %v1275_v12 = vld [vmem:[#allocation10 + $0x48] ss:$16 sps:$4 sm:$0xff]   ;;  %v1276_v13 = vld [vmem:[#allocation10 + $0x24] ss:$16 sps:$4 sm:$0xff]   ;;  %v1278_v14 = vld [vmem:[#allocation10 + $0x2c] ss:$16 sps:$4 sm:$0xff]   ;;  %547 = vmatprep.mubr.bf16.mxu1 %v1565_v15 }
  0x66   : > { %1081 = vmatprep.subr.msk.bf16.mxu0 %vm449_vm0, %v1078_v3  ;;  %1084 = vmatprep.subr.msk.bf16.mxu1 %vm449_vm0, %v1080_v4  ;;  %v451_v10 = vsel %vm449_vm0, %v1077_v5, 0  ;;  %v457_v11 = vsel %vm449_vm0, %v1079_v6, 0  ;;  %v1280_v16 = vld [vmem:[#allocation10 + $0x20] ss:$16 sps:$4 sm:$0xff]   ;;  %v1281_v17 = vld [vmem:[#allocation10 + $0x28] ss:$16 sps:$4 sm:$0xff]  }
  0x67   : > { %471 = vmatpush1.bf16.msra.mxu0 %v451_v10  ;;  %524 = vmatpush1.bf16.msra.mxu1 %v457_v11  ;;  %v1282_v18 = vld [vmem:[#allocation10 + $0x4] ss:$16 sps:$4 sm:$0xff]   ;;  %v1284_v19 = vld [vmem:[#allocation10 + $0xc] ss:$16 sps:$4 sm:$0xff]   ;;  %v1286_v20 = vld [vmem:[#allocation10] ss:$16 sps:$4 sm:$0xff]  }
  0x68   : > { %472 = vmatprep.subr.bf16.mxu0 %v1270_v7  ;;  %525 = vmatprep.subr.bf16.mxu1 %v1272_v8  ;;  %v1287_v21 = vld [vmem:[#allocation10 + $0x8] ss:$16 sps:$4 sm:$0xff]   ;;  %v318_v22 = vld [vmem:[%s1711_s15] sm:$0xff]  ;;  %vm442_vm1 = vcmask 408576   ;;  %v320_v25 = vld [vmem:[%s1711_s15 + $0x10] sm:$0xff]  ;;  %v343_v32 = vshrl.u32 %v342_v31, 7 }
  0x69   : > { %v319_v23 = vld [vmem:[%s1711_s15 + $0x8] sm:$0xff]  ;;  %v321_v26 = vld [vmem:[%s1711_s15 + $0x18] sm:$0xff]  ;;  %v1737_v28 = vld [vmem:[%s1828_s1] sm:$0xff]  ;;  %s1756_s19 = smov (!%p1062_p3), 0  }
  0x6a   : > { %v1133_v24 = vpack.c.bf16 %v319_v23, %v318_v22  ;;  %v1134_v27 = vpack.c.bf16 %v321_v26, %v320_v25  ;;  %v1739_v29 = vld [vmem:[#allocation3] sm:$0xff]   ;;  %v586_v30 = vld [vmem:[#allocation4] sm:$0xff]   ;;  %v344_v33 = vsub.s32 0, %v343_v32  ;;  %v352_v34 = vsub.s32 2, %v343_v32 }
  0x6b   : > { %473 = vmatpush1.bf16.msra.mxu0 %v1274_v9  ;;  %526 = vmatpush1.bf16.msra.mxu1 %v1275_v12  ;;  %v340_v35 = vld [vmem:[%s1832_s5] sm:$0xf]  ;;  %v348_v36 = vsub.s32 1, %v343_v32  ;;  %v356_v37 = vsub.s32 3, %v343_v32  ;;  %v1842_v10 = vmov %v586_v30  ;;  %v1843_v11 = vmov %v1739_v29 }
  0x6c   : > { %474 = vmatprep.subr.bf16.mxu0 %v1276_v13  ;;  %527 = vmatprep.subr.bf16.mxu1 %v1278_v14  ;;  %v345_v38 = vrot.slane %v340_v35, %v344_v33  ;;  %v353_v39 = vrot.slane %v340_v35, %v352_v34 }
  0x6d   : > { %v349_v40 = vrot.slane %v340_v35, %v348_v36  ;;  %v357_v41 = vrot.slane %v340_v35, %v356_v37 }
  0x6f   : > { %475 = vmatpush1.bf16.msra.mxu0 %v1280_v16  ;;  %528 = vmatpush1.bf16.msra.mxu1 %v1281_v17 }
  0x70   : > { %476 = vmatprep.subr.bf16.mxu0 %v1282_v18  ;;  %529 = vmatprep.subr.bf16.mxu1 %v1284_v19 }
  0x73   : > { %477 = vmatpush1.bf16.msra.mxu0 %v1286_v20  ;;  %530 = vmatpush1.bf16.msra.mxu1 %v1287_v21 }
  0x76   : > { %1082 = vmatmul.mubr.msk.bf16.vlgmr.msra.gmra.mxu0 %vm442_vm1, %v1133_v24  ;;  %1085 = vmatmul.mubr.msk.bf16.vlgmr.msra.gmra.mxu1 %vm442_vm1, %v1133_v24 }
  0x77   : > { %504 = vmatprep.mubr.bf16.mxu0 %v1565_v15  ;;  %557 = vmatprep.mubr.bf16.mxu1 %v1565_v15 }
  0x7e   : > { %1083 = vmatmul.mubr.msk.bf16.gmra.mxu0 %vm442_vm1, %v1134_v27  ;;  %1086 = vmatmul.mubr.msk.bf16.gmra.mxu1 %vm442_vm1, %v1134_v27 }
 0x136   : > { %v496_v42 = vpop.f32.mrf.mxu0  ;;  %v549_v43 = vpop.f32.mrf.mxu1 }
 0x137   : > { %v497_v44 = vadd.f32 %v496_v42, %v345_v38  ;;  %v550_v45 = vadd.f32 %v549_v43, %v353_v39 }
 0x138   : > { %v498_v46 = vpop.f32.mrf.mxu0  ;;  %v551_v47 = vpop.f32.mrf.mxu1 }
 0x139   : > { %568 = vst [vmem:[#allocation2] sm:$0xff] %v497_v44  ;;  %570 = vst [vmem:[#allocation2 + $0x10] sm:$0xff] %v550_v45  ;;  %v499_v48 = vadd.f32 %v498_v46, %v349_v40  ;;  %v552_v49 = vadd.f32 %v551_v47, %v357_v41 }
 0x13a   : > { %v500_v50 = vpop.f32.mrf.mxu0  ;;  %v553_v51 = vpop.f32.mrf.mxu1 }
 0x13b   : > { %569 = vst [vmem:[#allocation2 + $0x8] sm:$0xff] %v499_v48  ;;  %571 = vst [vmem:[#allocation2 + $0x18] sm:$0xff] %v552_v49  ;;  %v501_v52 = vadd.f32 %v500_v50, %v345_v38  ;;  %v554_v53 = vadd.f32 %v553_v51, %v353_v39 }
 0x13c   : > { %v502_v54 = vpop.f32.mrf.mxu0  ;;  %v555_v55 = vpop.f32.mrf.mxu1 }
 0x13d   : > { %572 = vst [vmem:[#allocation2 + $0x20] sm:$0xff] %v501_v52  ;;  %574 = vst [vmem:[#allocation2 + $0x30] sm:$0xff] %v554_v53  ;;  %v503_v56 = vadd.f32 %v502_v54, %v349_v40  ;;  %v556_v57 = vadd.f32 %v555_v55, %v357_v41 }
 0x13e   : > { %v506_v58 = vpop.f32.mrf.mxu0  ;;  %v559_v59 = vpop.f32.mrf.mxu1 }
 0x13f   : > { %573 = vst [vmem:[#allocation2 + $0x28] sm:$0xff] %v503_v56  ;;  %575 = vst [vmem:[#allocation2 + $0x38] sm:$0xff] %v556_v57  ;;  %v507_v60 = vadd.f32 %v506_v58, %v345_v38  ;;  %v560_v61 = vadd.f32 %v559_v59, %v353_v39 }
 0x140   : > { %v508_v62 = vpop.f32.mrf.mxu0  ;;  %v561_v63 = vpop.f32.mrf.mxu1 }
 0x141   : > { %576 = vst [vmem:[#allocation2 + $0x40] sm:$0xff] %v507_v60  ;;  %578 = vst [vmem:[#allocation2 + $0x50] sm:$0xff] %v560_v61  ;;  %v509_v0 = vadd.f32 %v508_v62, %v349_v40  ;;  %v562_v1 = vadd.f32 %v561_v63, %v357_v41 }
 0x142   : > { %v510_v2 = vpop.f32.mrf.mxu0  ;;  %v563_v3 = vpop.f32.mrf.mxu1 }
 0x143   : > { %577 = vst [vmem:[#allocation2 + $0x48] sm:$0xff] %v509_v0  ;;  %579 = vst [vmem:[#allocation2 + $0x58] sm:$0xff] %v562_v1  ;;  %v511_v4 = vadd.f32 %v510_v2, %v345_v38  ;;  %v564_v5 = vadd.f32 %v563_v3, %v353_v39  ;;  %979 = sbr.rel (%p1062_p3) target bundleno = 613 (0x265), region = 103 }
 0x144   : > { %v512_v6 = vpop.f32.mrf.mxu0  ;;  %v565_v7 = vpop.f32.mrf.mxu1 }
 0x145   : > { %580 = vst [vmem:[#allocation2 + $0x60] sm:$0xff] %v511_v4  ;;  %582 = vst [vmem:[#allocation2 + $0x70] sm:$0xff] %v564_v5  ;;  %v513_v8 = vadd.f32 %v512_v6, %v349_v40  ;;  %v566_v9 = vadd.f32 %v565_v7, %v357_v41 }
 0x147   : > { %581 = vst [vmem:[#allocation2 + $0x68] sm:$0xff] %v513_v8  ;;  %583 = vst [vmem:[#allocation2 + $0x78] sm:$0xff] %v566_v9 }
 0x148 LB: >> { %v1289_v12 = vld [vmem:[#allocation12 + $0xe4] ss:$16 sps:$4 sm:$0xff]   ;;  %v1291_v13 = vld [vmem:[#allocation12 + $0xe0] ss:$16 sps:$4 sm:$0xff]   ;;  %v1566_v14 = vmov 0   ;;  %s905_s20 = sadd.s32 %s1547_s19, %s1056_s14  ;;  %v602_v49 = vpack.c.bf16 %v1543_v29, %v1543_v29  ;;  %s1135_s22 = sshll.u32 %s1547_s19, 5  ;;  %s1547_s19 = sphi %s1756_s19, %s590_s19   ;;  %v1543_v29 = vphi %v1739_v29, %v1845_v29   ;;  %v1539_v30 = vphi %v586_v30, %v1844_v30  }
 0x149   : >> { %827 = vmatprep.mubr.bf16.mxu0 %v1566_v14  ;;  %868 = vmatprep.mubr.bf16.mxu1 %v1566_v14  ;;  %v1292_v15 = vld [vmem:[#allocation12 + $0xc4] ss:$16 sps:$4 sm:$0xff]   ;;  %v1294_v16 = vld [vmem:[#allocation12 + $0xc0] ss:$16 sps:$4 sm:$0xff]   ;;  %v906_v17 = vstv %s905_s20  ;;  %v1300_v19 = vld [vmem:[#allocation12 + $0xec] ss:$16 sps:$4 sm:$0xff]  }
 0x14a   : >> { %795 = vmatprep.subr.bf16.mxu0 %v1289_v12  ;;  %1288 = vset.pattern.permute.xlu0 %v1566_v14  ;;  %v1295_v18 = vld [vmem:[#allocation12 + $0xa4] ss:$16 sps:$4 sm:$0xff]   ;;  %vm907_vm2 = vcmp.lt.s32.totalorder %v906_v17, %v1737_v28  ;;  %v1303_v21 = vld [vmem:[#allocation12 + $0xe8] ss:$16 sps:$4 sm:$0xff]   ;;  %v1297_v22 = vld [vmem:[#allocation12 + $0xa0] ss:$16 sps:$4 sm:$0xff]  }
 0x14b   : >> { %796 = vmatpush1.bf16.msra.mxu0 %v1291_v13  ;;  %v908_v20 = vsel %vm907_vm2, 1, %v1566_v14  ;;  %836 = vmatprep.subr.bf16.mxu1 %v1300_v19  ;;  %v1298_v23 = vld [vmem:[#allocation12 + $0x84] ss:$16 sps:$4 sm:$0xff]   ;;  %v1306_v24 = vld [vmem:[#allocation12 + $0xcc] ss:$16 sps:$4 sm:$0xff]   ;;  %s597_s8 = scalar_lea.vmem [#allocation2], %s1135_s22 }
 0x14c   : >> { %797 = vmatprep.subr.bf16.mxu0 %v1292_v15  ;;  %910 = vperm.xlu0 %1288, %v908_v20   ;;  %v1309_v25 = vld [vmem:[#allocation12 + $0xc8] ss:$16 sps:$4 sm:$0xff]   ;;  %v1302_v26 = vld [vmem:[#allocation12 + $0x80] ss:$16 sps:$4 sm:$0xff]   ;;  %v1304_v27 = vld [vmem:[#allocation12 + $0x64] ss:$16 sps:$4 sm:$0xff]  }
 0x14d   : >> { %837 = vmatpush1.bf16.msra.mxu1 %v1303_v21  ;;  %v1312_v31 = vld [vmem:[#allocation12 + $0xac] ss:$16 sps:$4 sm:$0xff]   ;;  %v1315_v32 = vld [vmem:[#allocation12 + $0xa8] ss:$16 sps:$4 sm:$0xff]   ;;  %v1308_v34 = vld [vmem:[#allocation12 + $0x60] ss:$16 sps:$4 sm:$0xff]  }
 0x14e   : >> { %838 = vmatprep.subr.bf16.mxu1 %v1306_v24  ;;  %v1318_v33 = vld [vmem:[#allocation12 + $0x8c] ss:$16 sps:$4 sm:$0xff]   ;;  %v1310_v35 = vld [vmem:[#allocation12 + $0x44] ss:$16 sps:$4 sm:$0xff]   ;;  %v1321_v36 = vld [vmem:[#allocation12 + $0x88] ss:$16 sps:$4 sm:$0xff]  }
 0x14f   : >> { %798 = vmatpush1.bf16.msra.mxu0 %v1294_v16  ;;  %v1324_v37 = vld [vmem:[#allocation12 + $0x6c] ss:$16 sps:$4 sm:$0xff]   ;;  %v1314_v38 = vld [vmem:[#allocation12 + $0x40] ss:$16 sps:$4 sm:$0xff]   ;;  %v1316_v39 = vld [vmem:[#allocation12 + $0x24] ss:$16 sps:$4 sm:$0xff]  }
 0x150   : >> { %799 = vmatprep.subr.bf16.mxu0 %v1295_v18  ;;  %v1327_v40 = vld [vmem:[#allocation12 + $0x68] ss:$16 sps:$4 sm:$0xff]   ;;  %v1328_v41 = vld [vmem:[#allocation12 + $0x4c] ss:$16 sps:$4 sm:$0xff]   ;;  %v1320_v42 = vld [vmem:[#allocation12 + $0x20] ss:$16 sps:$4 sm:$0xff]  }
 0x151   : >> { %839 = vmatpush1.bf16.msra.mxu1 %v1309_v25  ;;  %v1322_v43 = vld [vmem:[#allocation12 + $0x4] ss:$16 sps:$4 sm:$0xff]   ;;  %v1330_v44 = vld [vmem:[#allocation12 + $0x48] ss:$16 sps:$4 sm:$0xff]   ;;  %v1331_v45 = vld [vmem:[#allocation12 + $0x2c] ss:$16 sps:$4 sm:$0xff]  }
 0x152   : >> { %840 = vmatprep.subr.bf16.mxu1 %v1312_v31  ;;  %v1326_v46 = vld [vmem:[#allocation12] ss:$16 sps:$4 sm:$0xff]   ;;  %v1333_v47 = vld [vmem:[#allocation12 + $0x28] ss:$16 sps:$4 sm:$0xff]   ;;  %v1334_v48 = vld [vmem:[#allocation12 + $0xc] ss:$16 sps:$4 sm:$0xff]  }
 0x153   : >> { %800 = vmatpush1.bf16.msra.mxu0 %v1297_v22  ;;  %v1336_v50 = vld [vmem:[#allocation12 + $0x8] ss:$16 sps:$4 sm:$0xff]   ;;  %v598_v51 = vld [vmem:[%s597_s8] sm:$0xff]  ;;  %v600_v63 = vld [vmem:[%s597_s8 + $0x10] sm:$0xff]  ;;  %s590_s19 = sadd.s32 1, %s1547_s19  }
 0x154   : >> { %801 = vmatprep.subr.bf16.mxu0 %v1298_v23  ;;  %v599_v53 = vld [vmem:[%s597_s8 + $0x8] sm:$0xff]  ;;  %v601_v3 = vld [vmem:[%s597_s8 + $0x18] sm:$0xff]  ;;  %p589_p7 = scmp.ge.s32.totalorder %s590_s19, %s1859_s30 }
 0x155   : >> { %841 = vmatpush1.bf16.msra.mxu1 %v1315_v32 }
 0x156   : >> { %842 = vmatprep.subr.bf16.mxu1 %v1318_v33 }
 0x157   : >> { %802 = vmatpush1.bf16.msra.mxu0 %v1302_v26 }
 0x158   : >> { %803 = vmatprep.subr.bf16.mxu0 %v1304_v27 }
 0x159   : >> { %843 = vmatpush1.bf16.msra.mxu1 %v1321_v36 }
 0x15a   : >> { %844 = vmatprep.subr.bf16.mxu1 %v1324_v37 }
 0x15b   : >> { %804 = vmatpush1.bf16.msra.mxu0 %v1308_v34 }
 0x15c   : >> { %805 = vmatprep.subr.bf16.mxu0 %v1310_v35 }
 0x15d   : >> { %845 = vmatpush1.bf16.msra.mxu1 %v1327_v40 }
 0x15e   : >> { %846 = vmatprep.subr.bf16.mxu1 %v1328_v41 }
 0x15f   : >> { %806 = vmatpush1.bf16.msra.mxu0 %v1314_v38 }
 0x160   : >> { %807 = vmatprep.subr.bf16.mxu0 %v1316_v39 }
 0x161   : >> { %847 = vmatpush1.bf16.msra.mxu1 %v1330_v44 }
 0x162   : >> { %848 = vmatprep.subr.bf16.mxu1 %v1331_v45 }
 0x163   : >> { %808 = vmatpush1.bf16.msra.mxu0 %v1320_v42 }
 0x164   : >> { %809 = vmatprep.subr.bf16.mxu0 %v1322_v43 }
 0x165   : >> { %849 = vmatpush1.bf16.msra.mxu1 %v1333_v47 }
 0x166   : >> { %850 = vmatprep.subr.bf16.mxu1 %v1334_v48 }
 0x167   : >> { %810 = vmatpush1.bf16.msra.mxu0 %v1326_v46 }
 0x169   : >> { %851 = vmatpush1.bf16.msra.mxu1 %v1336_v50 }
 0x16a   : >> { %828 = vmatmul.mubr.bf16.vlgmr.msra.gmra.mxu0 %v602_v49 }
 0x16c   : >> { %869 = vmatmul.mubr.bf16.vlgmr.msra.gmra.mxu1 %v602_v49 }
 0x1c7   : >> { %v911_v13 = vpop.permute.xlu0 %910 }
 0x1c8   : >> { %vm912_vm3 = vcmp.eq.s32.totalorder %v911_v13, 1 }
 0x22a   : >> { %v829_v52 = vpop.f32.mrf.mxu0 }
 0x22b   : >> { %v877_v54 = vadd.f32 %v829_v52, %v598_v51 }
 0x22c   : >> { %v831_v55 = vpop.f32.mrf.mxu0  ;;  %v870_v60 = vpop.f32.mrf.mxu1 }
 0x22d   : >> { %v1122_v56 = vmul.f32 -1.442695, %v877_v54  ;;  %v878_v57 = vadd.f32 %v831_v55, %v599_v53  ;;  %v879_v1 = vadd.f32 %v870_v60, %v600_v63 }
 0x22e   : >> { %v833_v58 = vpop.f32.mrf.mxu0  ;;  %v872_v62 = vpop.f32.mrf.mxu1 }
 0x22f   : >> { %1337 = vpow2.f32 %v1122_v56  ;;  %v1123_v59 = vmul.f32 -1.442695, %v878_v57  ;;  %v1124_v4 = vmul.f32 -1.442695, %v879_v1  ;;  %v880_v5 = vadd.f32 %v872_v62, %v601_v3 }
 0x230   : >> { %v834_v61 = vpop.f32.mrf.mxu0  ;;  %v874_v0 = vpop.f32.mrf.mxu1 }
 0x231   : >> { %1339 = vpow2.f32 %v1123_v59 }
 0x232   : >> { %v875_v2 = vpop.f32.mrf.mxu1  ;;  %1341 = vpow2.f32 %v1124_v4 }
 0x233   : >> { %1343 = vtanh.f32 %v880_v5 }
 0x23c   : >> { %v1338_v6 = vpop.eup %1337 }
 0x23d   : >> { %v890_v7 = vadd.f32 1.0, %v1338_v6 }
 0x23e   : >> { %v1340_v8 = vpop.eup %1339 }
 0x23f   : >> { %1345 = vrcp.f32 %v890_v7  ;;  %v891_v9 = vadd.f32 1.0, %v1340_v8  ;;  %v1342_v10 = vpop.eup %1341 }
 0x240   : >> { %v1344_v11 = vpop.eup %1343  ;;  %v892_v15 = vadd.f32 1.0, %v1342_v10 }
 0x241   : >> { %1347 = vrcp.f32 %v891_v9 }
 0x242   : >> { %1349 = vrcp.f32 %v892_v15 }
 0x24c   : >> { %v1346_v12 = vpop.eup %1345 }
 0x24d   : >> { %v901_v17 = vmul.f32 %v1346_v12, %v1344_v11 }
 0x24e   : >> { %v1348_v14 = vpop.eup %1347 }
 0x24f   : >> { %v900_v16 = vmul.f32 %v1539_v30, %v1348_v14  ;;  %v1350_v20 = vpop.eup %1349 }
 0x251   : >> { %v902_v18 = vadd.f32 %v901_v17, %v900_v16 }
 0x253   : >> { %1351 = vtanh.f32 %v902_v18  ;;  %v914_v19 = vsel %vm912_vm3, %v902_v18, %v1539_v30  }
 0x254   : >> { %v1844_v30 = vmov %v914_v19  ;;  %v1846_v10 = vmov (%p589_p7), %v914_v19 }
 0x260   : >> { %v1352_v21 = vpop.eup %1351  ;;  %592 = sbr.rel (!%p589_p7) target bundleno = 328 (0x148), region = 109 }
 0x261   : >> { %v904_v22 = vmul.f32 %v1352_v21, %v1350_v20 }
 0x263   : >> { %v913_v23 = vsel %vm912_vm3, %v904_v22, %v1543_v29  }
 0x264   : >> { %v1845_v29 = vmov %v913_v23  ;;  %v1847_v11 = vmov (%p589_p7), %v913_v23 }
 0x265 PF: > { %915 = vst [vmem:[#allocation3] sm:$0xff] %v1555_v11  ;;  %916 = vst [vmem:[#allocation4] sm:$0xff] %v1551_v10  ;;  %v1555_v11 = vphi %v1843_v11, %v1847_v11   ;;  %v1551_v10 = vphi %v1842_v10, %v1846_v10  }
 0x266 PF: > { %p1125_p6 = scmp.ne.s32.totalorder %s1527_s26, 1 }
 0x268   : > { %920 = sbr.rel (%p1125_p6) target bundleno = 623 (0x26f), region = 71 }
 0x26d   : > { %v921_v29 = vld [vmem:[#allocation3] sm:$0xff] }
 0x26e   : > { %922 = vst [vmem:[#allocation13] sm:$0xff] %v921_v29 }
 0x26f PF: > { %p1794_p9 = scmp.eq.s32.totalorder %s1042_s0, 1  ;;  %s1567_s10 = smov [#allocation13]  }
 0x270   : > { %s932_s23 = sshll.u32 %s1567_s10, 4  ;;  %s933_s23 = int_to_ptr.vmem [resolvable:$true] %s932_s23 }
 0x271   : > { %s1433_s13 = scalar_lea.vmem %s933_s23, 128  ;;  %p1440_p1 = scmp.lt.s32.totalorder %s933_s23, %s933_s23 }
 0x272   : > { %p1434_p10 = scmp.ne.s32.totalorder %s933_s23, %s1433_s13  ;;  %p1441_p8 = scmp.lt.s32.totalorder %s1433_s13, %s1433_s13 }
 0x274   : > { %p1435_p12 = pnand %p1434_p10, %p1794_p9  ;;  %p1442_p13 = por %p1441_p8, %p1440_p1 }
 0x276   : > { %p1436_p11 = pneg %p1435_p12 }
 0x278   : > { %p1443_p0 = pnand %p1442_p13, %p1436_p11 }
 0x27a   : > { %1446 = shalt.err (!%p1443_p0)
}
 0x27b   : > { %1147 = dma.vmem_to_hbm [thread:$0]  (%p1794_p9), %s933_s23, 128, %s1833_s6, [#allocation9]  }
 0x27c   : > { %1510 = dma.done.wait (%p1794_p9), [#allocation9], 128  }
 0x27d   : > { %1512 = vsyncadd (%p1794_p9), [#allocation9], 4294967168 }
 0x27e PF: > { %s22_s28 = sadd.s32 1, %s1535_s28   ;;  %s1849_s23 = smov %s1519_s24 }
 0x27f   : > { %p19_p5 = scmp.ge.s32.totalorder %s22_s28, 4   ;;  %s1850_s24 = smov %s1523_s25 }
 0x280   : > { %s1851_s25 = smov %s1693_s11  ;;  %s1852_s26 = smov %s1531_s27 }
 0x281   : > { %s1853_s27 = smov %s1855_s21  ;;  %21 = sbr.rel (!%p19_p5) target bundleno = 8 (0x8), region = 120 }
 0x286   :  { %945 = vsyncpa [#allocation8], 1 }
 0x287   :  { %947 = vsyncpa [#allocation8 + $0x1], 1 }
 0x288   :  { %948 = vsyncpa [#allocation11], 1 }
 0x289   :  { %949 = vsyncpa [#allocation9], 1 }
 0x28a   :  { %951 = vsyncpa [#allocation9 + $0x1], 1 }

</bundles_post_ra>
